<compile_context>
chip_gen: v7x
topology: tpu7x:2x2x1
jax: 0.10.0
libtpu: 0.0.40
codegen_flags: <defaults>
</compile_context>

<pallas_src>
import functools

import jax
import jax.numpy as jnp
from jax.experimental import pallas as pl
from jax.experimental.pallas import tpu as pltpu


def _round_up(x, m):
    return ((x + m - 1) // m) * m


def _block_spec(block_shape, index_map, buffer_count=None):
    """BlockSpec with an optional pipeline depth; falls back to default."""
    if buffer_count is not None and buffer_count != 2:
        try:
            return pl.BlockSpec(block_shape, index_map,
                                pipeline_mode=pl.Buffered(buffer_count))
        except Exception:  # older jax without pipeline_mode / Buffered(n)
            pass
    return pl.BlockSpec(block_shape, index_map)


def _layer_norm_rows(x, g, beta, *, eps, inv_h):
    """Row-wise LayerNorm of f32 x:(tm,H) with one-pass stats."""
    sx = jnp.sum(x, axis=-1, keepdims=True)
    sxx = jnp.sum(x * x, axis=-1, keepdims=True)
    mean = sx * inv_h
    var = jnp.maximum(sxx * inv_h - mean * mean, 0.0)
    y = (x - mean) * jax.lax.rsqrt(var + eps)
    return y * g + beta


def _fused_kernel(h_ref, res_ref, w_ref, b_ref, g_ref, beta_ref, o_ref,
                  *, eps, inv_h):
    # h_ref   : (tm, I)  bf16 intermediate activations (row tile)
    # res_ref : (tm, H)  residual (input_tensor) tile
    # w_ref   : (I, H)   bf16 dense weight, VMEM-resident (constant index)
    # b/g/beta: (1, H)   f32 dense bias / LN gamma / LN beta
    # o_ref   : (tm, H)  output tile
    x = jnp.dot(h_ref[...], w_ref[...], preferred_element_type=jnp.float32)
    # Dropout(hidden_dropout_prob) is identity at inference time.
    # TODO(synk): training-mode dropout (RNG mask) not implemented.
    x = x + b_ref[...] + res_ref[...].astype(jnp.float32)
    o_ref[...] = _layer_norm_rows(x, g_ref[...], beta_ref[...],
                                  eps=eps, inv_h=inv_h).astype(o_ref.dtype)


def _ktiled_kernel(h_ref, res_ref, w_ref, b_ref, g_ref, beta_ref, o_ref,
                   acc_ref, *, eps, inv_h):
    # Fallback for weights too large to keep resident: K is a reduction grid
    # axis with a (tm, H) f32 accumulator initialized to the bias.
    k = pl.program_id(1)

    @pl.when(k == 0)
    def _():
        acc_ref[...] = jnp.broadcast_to(b_ref[...], acc_ref.shape)

    acc_ref[...] += jnp.dot(h_ref[...], w_ref[...],
                            preferred_element_type=jnp.float32)

    @pl.when(k == pl.num_programs(1) - 1)
    def _():
        x = acc_ref[...] + res_ref[...].astype(jnp.float32)
        o_ref[...] = _layer_norm_rows(x, g_ref[...], beta_ref[...],
                                      eps=eps, inv_h=inv_h).astype(o_ref.dtype)


def elastic_bert_output(hidden_states, input_tensor, w, b, gamma, beta,
                        *, eps=1e-12, row_tile=512, k_tile=512,
                        compute_dtype=jnp.bfloat16,
                        resident_weight_max_bytes=24 * 1024 * 1024):
    """hidden_states: [B, S, I], input_tensor: [B, S, H] -> [B, S, H].

    `w` is the dense weight in (I, H) = (in, out) layout (transpose of the
    PyTorch nn.Linear weight).
    """
    B, S, I = hidden_states.shape
    H = input_tensor.shape[-1]
    out_dtype = hidden_states.dtype
    rows = B * S

    # ---- row tiling --------------------------------------------------------
    # Big tiles amortize the ~0.35us/step overhead; keep tm a multiple of 8
    # and split into >= 2 tiles when possible so the parallel row axis can be
    # sharded across both TensorCores on v7x.
    tm = min(row_tile, _round_up(rows, 8))
    while tm > 8 and pl.cdiv(rows, tm) < 2:
        tm = _round_up(tm // 2, 8)
    rows_p = _round_up(rows, tm)

    # ---- weight residency decision (by bytes, not a fixed k_tile) ----------
    itemsize = jnp.dtype(compute_dtype).itemsize
    weight_bytes = I * H * itemsize
    resident = weight_bytes <= resident_weight_max_bytes

    # ---- input prep (avoid copies when dtypes already match) ---------------
    h2 = hidden_states.reshape(rows, I)
    if h2.dtype != compute_dtype:
        h2 = h2.astype(compute_dtype)
    r2 = input_tensor.reshape(rows, H)
    w2 = w if w.dtype == compute_dtype else w.astype(compute_dtype)
    if rows_p != rows:
        h2 = jnp.pad(h2, ((0, rows_p - rows), (0, 0)))
        r2 = jnp.pad(r2, ((0, rows_p - rows), (0, 0)))

    # Small params cast to f32 once here (no per-step astype in the kernel).
    b2 = b.astype(jnp.float32).reshape(1, H)
    g2 = gamma.astype(jnp.float32).reshape(1, H)
    beta2 = beta.astype(jnp.float32).reshape(1, H)

    inv_h = 1.0 / float(H)
    res_bytes = tm * H * r2.dtype.itemsize
    out_bytes = tm * H * jnp.dtype(out_dtype).itemsize

    if resident:
        # Single-buffer the big constant blocks only when they are large
        # enough to matter (never fires at toy shapes -> no behavior change).
        single_buf = (2 * weight_bytes) > (12 * 1024 * 1024)
        cbuf = 1 if single_buf else None

        grid = (rows_p // tm,)
        footprint = (2 * tm * I * itemsize                    # h (double-buf)
                     + (1 if single_buf else 2) * weight_bytes
                     + 2 * res_bytes + 2 * out_bytes
                     + 6 * H * 4)
        vmem_limit = max(16 << 20,
                         min(48 << 20, int(footprint * 1.25) + (2 << 20)))

        out = pl.pallas_call(
            functools.partial(_fused_kernel, eps=eps, inv_h=inv_h),
            out_shape=jax.ShapeDtypeStruct((rows_p, H), out_dtype),
            grid_spec=pltpu.PrefetchScalarGridSpec(
                num_scalar_prefetch=0,
                grid=grid,
                in_specs=[
                    pl.BlockSpec((tm, I), lambda i: (i, 0)),        # activations
                    pl.BlockSpec((tm, H), lambda i: (i, 0)),        # residual
                    _block_spec((I, H), lambda i: (0, 0), cbuf),    # weight
                    _block_spec((1, H), lambda i: (0, 0), cbuf),    # bias
                    _block_spec((1, H), lambda i: (0, 0), cbuf),    # gamma
                    _block_spec((1, H), lambda i: (0, 0), cbuf),    # beta
                ],
                out_specs=pl.BlockSpec((tm, H), lambda i: (i, 0)),
            ),
            compiler_params=pltpu.CompilerParams(
                dimension_semantics=("parallel",),
                vmem_limit_bytes=vmem_limit,
            ),
        )(h2, r2, w2, b2, g2, beta2)
    else:
        # Streamed-weight fallback for very large intermediate sizes.
        tk = min(k_tile, _round_up(I, 128))
        I_p = _round_up(I, tk)
        if I_p != I:  # only fires on this fallback path
            h2 = jnp.pad(h2, ((0, 0), (0, I_p - I)))
            w2 = jnp.pad(w2, ((0, I_p - I), (0, 0)))
        n_k = I_p // tk
        sbuf = 3 if n_k >= 3 else None   # deeper pipelining on streamed blocks

        grid = (rows_p // tm, n_k)
        footprint = ((3 if sbuf else 2) * tm * tk * itemsize   # h tiles
                     + (3 if sbuf else 2) * tk * H * itemsize  # weight tiles
                     + 2 * res_bytes + 2 * out_bytes
                     + tm * H * 4                              # f32 accumulator
                     + 6 * H * 4)
        vmem_limit = max(16 << 20,
                         min(48 << 20, int(footprint * 1.25) + (2 << 20)))

        out = pl.pallas_call(
            functools.partial(_ktiled_kernel, eps=eps, inv_h=inv_h),
            out_shape=jax.ShapeDtypeStruct((rows_p, H), out_dtype),
            grid_spec=pltpu.PrefetchScalarGridSpec(
                num_scalar_prefetch=0,
                grid=grid,
                in_specs=[
                    _block_spec((tm, tk), lambda i, k: (i, k), sbuf),  # activations
                    pl.BlockSpec((tm, H), lambda i, k: (i, 0)),        # residual
                    _block_spec((tk, H), lambda i, k: (k, 0), sbuf),   # weight
                    pl.BlockSpec((1, H), lambda i, k: (0, 0)),         # bias
                    pl.BlockSpec((1, H), lambda i, k: (0, 0)),         # gamma
                    pl.BlockSpec((1, H), lambda i, k: (0, 0)),         # beta
                ],
                out_specs=pl.BlockSpec((tm, H), lambda i, k: (i, 0)),
                scratch_shapes=[pltpu.VMEM((tm, H), jnp.float32)],
            ),
            compiler_params=pltpu.CompilerParams(
                dimension_semantics=("parallel", "arbitrary"),
                vmem_limit_bytes=vmem_limit,
            ),
        )(h2, r2, w2, b2, g2, beta2)

    return out[:rows].reshape(B, S, H)


def _reference(hidden_states, input_tensor, w, b, gamma, beta, *, eps=1e-12,
               compute_dtype=jnp.bfloat16):
    """Pure-JAX reference matching the kernel's numerics (bf16 matmul, f32 acc)."""
    x = jnp.einsum("bsi,ih->bsh",
                   hidden_states.astype(compute_dtype),
                   w.astype(compute_dtype),
                   preferred_element_type=jnp.float32)
    x = x + b.astype(jnp.float32) + input_tensor.astype(jnp.float32)
    mean = jnp.mean(x, axis=-1, keepdims=True)
    var = jnp.mean((x - mean) ** 2, axis=-1, keepdims=True)
    y = (x - mean) * jax.lax.rsqrt(var + eps)
    y = y * gamma.astype(jnp.float32) + beta.astype(jnp.float32)
    return y.astype(hidden_states.dtype)


def _check(B, S, H, I, *, eps=1e-12, seed=0, **kw):
    key = jax.random.PRNGKey(seed)
    k1, k2, k3, k4 = jax.random.split(key, 4)

    hidden_states = jax.random.normal(k1, (B, S, I), dtype=jnp.float32)
    input_tensor = jax.random.normal(k2, (B, S, H), dtype=jnp.float32)
    # PyTorch Linear weight is (H, I); we use the (I, H) transpose (in x out).
    w = (jax.random.normal(k3, (I, H), dtype=jnp.float32) *
         (1.0 / jnp.sqrt(jnp.float32(I))))
    b = jax.random.normal(k4, (H,), dtype=jnp.float32) * 0.02
    gamma = jnp.ones((H,), dtype=jnp.float32)
    beta = jnp.zeros((H,), dtype=jnp.float32)

    out = elastic_bert_output(hidden_states, input_tensor, w, b, gamma, beta,
                              eps=eps, **kw)
    out = jax.block_until_ready(out)
    ref = _reference(hidden_states, input_tensor, w, b, gamma, beta, eps=eps)

    assert out.shape == (B, S, H)
    err = float(jnp.max(jnp.abs(out.astype(jnp.float32) -
                                ref.astype(jnp.float32))))
    assert jnp.allclose(out, ref, atol=2e-3, rtol=2e-3), err
    return err


if __name__ == "__main__":
    # Base config consistent with the module: batch=2, seq=8, hidden=32,
    # intermediate=64.  Resident-weight (single K step) fused path.
    _check(B=2, S=8, H=32, I=64)
    # Non-divisible row count -> exercises the row-padding path.
    _check(B=2, S=7, H=32, I=64)
    # Force the streamed-weight fallback (K-split accumulator with
    # pl.when init/finalize) by disallowing weight residency.
    _check(B=1, S=8, H=32, I=256, resident_weight_max_bytes=0, k_tile=128)
    print("KERNEL_OK")
</pallas_src>

<mosaic_0001>
module attributes {stable_mosaic.version = 11 : i64} {
  func.func @_fused_kernel(%arg0: i32, %arg1: memref<8x64xbf16, #tpu.memory_space<vmem>>, %arg2: memref<8x32xf32, #tpu.memory_space<vmem>>, %arg3: memref<64x32xbf16, #tpu.memory_space<vmem>>, %arg4: memref<1x32xf32, #tpu.memory_space<vmem>>, %arg5: memref<1x32xf32, #tpu.memory_space<vmem>>, %arg6: memref<1x32xf32, #tpu.memory_space<vmem>>, %arg7: memref<8x32xf32, #tpu.memory_space<vmem>>) attributes {dimension_semantics = [#tpu.dimension_semantics<parallel>], iteration_bounds = array<i64: 2>, scalar_prefetch = 0 : i64, scratch_operands = 0 : i64, tpu.core_type = #tpu.core_type<tc>, window_params = [{transform_indices = @transform_0, window_bounds = array<i64: 8, 64>}, {transform_indices = @transform_1, window_bounds = array<i64: 8, 32>}, {pipeline_mode = #tpu.pipeline_mode<synchronous>, transform_indices = @transform_2, window_bounds = array<i64: 64, 32>}, {pipeline_mode = #tpu.pipeline_mode<synchronous>, transform_indices = @transform_3, window_bounds = array<i64: 1, 32>}, {pipeline_mode = #tpu.pipeline_mode<synchronous>, transform_indices = @transform_4, window_bounds = array<i64: 1, 32>}, {pipeline_mode = #tpu.pipeline_mode<synchronous>, transform_indices = @transform_5, window_bounds = array<i64: 1, 32>}, {transform_indices = @transform_6, window_bounds = array<i64: 8, 32>}]} {
    %c0 = arith.constant 0 : index
    %c0_0 = arith.constant 0 : index
    %0 = vector.load %arg1[%c0, %c0_0] : memref<8x64xbf16, #tpu.memory_space<vmem>>, vector<8x64xbf16>
    %c0_1 = arith.constant 0 : index
    %c0_2 = arith.constant 0 : index
    %1 = vector.load %arg3[%c0_1, %c0_2] : memref<64x32xbf16, #tpu.memory_space<vmem>>, vector<64x32xbf16>
    %cst = arith.constant dense<0.000000e+00> : vector<8x32xf32>
    %2 = tpu.matmul %0, %1, %cst {dimension_numbers = #tpu.dot_dimension_numbers<[1], [0], [0], [1], [0, 0, 1, 1], [], []>} : vector<8x64xbf16>, vector<64x32xbf16>, vector<8x32xf32> -> vector<8x32xf32>
    %c0_3 = arith.constant 0 : index
    %c0_4 = arith.constant 0 : index
    %3 = vector.load %arg4[%c0_3, %c0_4] : memref<1x32xf32, #tpu.memory_space<vmem>>, vector<1x32xf32>
    %4 = vector.broadcast %3 : vector<1x32xf32> to vector<8x32xf32>
    %5 = arith.addf %2, %4 : vector<8x32xf32>
    %c0_5 = arith.constant 0 : index
    %c0_6 = arith.constant 0 : index
    %6 = vector.load %arg2[%c0_5, %c0_6] : memref<8x32xf32, #tpu.memory_space<vmem>>, vector<8x32xf32>
    %7 = arith.addf %5, %6 : vector<8x32xf32>
    %c0_7 = arith.constant 0 : index
    %c0_8 = arith.constant 0 : index
    %8 = vector.load %arg5[%c0_7, %c0_8] : memref<1x32xf32, #tpu.memory_space<vmem>>, vector<1x32xf32>
    %c0_9 = arith.constant 0 : index
    %c0_10 = arith.constant 0 : index
    %9 = vector.load %arg6[%c0_9, %c0_10] : memref<1x32xf32, #tpu.memory_space<vmem>>, vector<1x32xf32>
    %cst_11 = arith.constant dense<0.000000e+00> : vector<8xf32>
    %10 = vector.multi_reduction <add>, %7, %cst_11 [1] : vector<8x32xf32> to vector<8xf32>
    %11 = vector.shape_cast %10 : vector<8xf32> to vector<8x1xf32>
    %12 = arith.mulf %7, %7 : vector<8x32xf32>
    %cst_12 = arith.constant dense<0.000000e+00> : vector<8xf32>
    %13 = vector.multi_reduction <add>, %12, %cst_12 [1] : vector<8x32xf32> to vector<8xf32>
    %14 = vector.shape_cast %13 : vector<8xf32> to vector<8x1xf32>
    %cst_13 = arith.constant 3.125000e-02 : f32
    %15 = vector.broadcast %cst_13 : f32 to vector<8x1xf32>
    %16 = arith.mulf %11, %15 : vector<8x1xf32>
    %cst_14 = arith.constant 3.125000e-02 : f32
    %17 = vector.broadcast %cst_14 : f32 to vector<8x1xf32>
    %18 = arith.mulf %14, %17 : vector<8x1xf32>
    %19 = arith.mulf %16, %16 : vector<8x1xf32>
    %20 = arith.subf %18, %19 : vector<8x1xf32>
    %cst_15 = arith.constant 0.000000e+00 : f32
    %21 = vector.broadcast %cst_15 : f32 to vector<8x1xf32>
    %22 = arith.maximumf %20, %21 : vector<8x1xf32>
    %23 = vector.broadcast %16 : vector<8x1xf32> to vector<8x32xf32>
    %24 = arith.subf %7, %23 : vector<8x32xf32>
    %cst_16 = arith.constant 9.99999996E-13 : f32
    %25 = vector.broadcast %cst_16 : f32 to vector<8x1xf32>
    %26 = arith.addf %22, %25 : vector<8x1xf32>
    %27 = math.rsqrt %26 : vector<8x1xf32>
    %28 = vector.broadcast %27 : vector<8x1xf32> to vector<8x32xf32>
    %29 = arith.mulf %24, %28 : vector<8x32xf32>
    %30 = vector.broadcast %8 : vector<1x32xf32> to vector<8x32xf32>
    %31 = arith.mulf %29, %30 : vector<8x32xf32>
    %32 = vector.broadcast %9 : vector<1x32xf32> to vector<8x32xf32>
    %33 = arith.addf %31, %32 : vector<8x32xf32>
    %c0_17 = arith.constant 0 : index
    %c0_18 = arith.constant 0 : index
    %34 = vector.load %arg7[%c0_17, %c0_18] : memref<8x32xf32, #tpu.memory_space<vmem>>, vector<8x32xf32>
    tpu.vector_store %arg7[%c0_17, %c0_18], %33 {strides = array<i32>} : memref<8x32xf32, #tpu.memory_space<vmem>>, vector<8x32xf32>,
    return
  }
  func.func @transform_0(%arg0: i32) -> (i32, i32) {
    %c0_i32 = arith.constant 0 : i32
    %c0_i32_0 = arith.constant 0 : i32
    return %arg0, %c0_i32 : i32, i32
  }
  func.func @transform_1(%arg0: i32) -> (i32, i32) {
    %c0_i32 = arith.constant 0 : i32
    %c0_i32_0 = arith.constant 0 : i32
    return %arg0, %c0_i32 : i32, i32
  }
  func.func @transform_2(%arg0: i32) -> (i32, i32) {
    %c0_i32 = arith.constant 0 : i32
    %c0_i32_0 = arith.constant 0 : i32
    %c0_i32_1 = arith.constant 0 : i32
    return %c0_i32, %c0_i32_0 : i32, i32
  }
  func.func @transform_3(%arg0: i32) -> (i32, i32) {
    %c0_i32 = arith.constant 0 : i32
    %c0_i32_0 = arith.constant 0 : i32
    %c0_i32_1 = arith.constant 0 : i32
    return %c0_i32, %c0_i32_0 : i32, i32
  }
  func.func @transform_4(%arg0: i32) -> (i32, i32) {
    %c0_i32 = arith.constant 0 : i32
    %c0_i32_0 = arith.constant 0 : i32
    %c0_i32_1 = arith.constant 0 : i32
    return %c0_i32, %c0_i32_0 : i32, i32
  }
  func.func @transform_5(%arg0: i32) -> (i32, i32) {
    %c0_i32 = arith.constant 0 : i32
    %c0_i32_0 = arith.constant 0 : i32
    %c0_i32_1 = arith.constant 0 : i32
    return %c0_i32, %c0_i32_0 : i32, i32
  }
  func.func @transform_6(%arg0: i32) -> (i32, i32) {
    %c0_i32 = arith.constant 0 : i32
    %c0_i32_0 = arith.constant 0 : i32
    return %arg0, %c0_i32 : i32, i32
  }
}

</mosaic_0001>

<bundles_post_ra>
// kernel: tpu_custom_call.1
= control target key start
LH: loop header
LB: loop body
LE: loop exit
PB: predicated region body
PF: predicated region fallthrough
CT: control target
= control target key end

     0   :  { %11 = vsyncpa [#allocation3], 0  ;;  %s782_s0 = inlined_call_operand.vmem [shape: bf16[16,64], index: 0, kind: input, shape index: {}]   ;;  %s783_s1 = inlined_call_operand.vmem [shape: f32[16,32], index: 1, kind: input, shape index: {}]   ;;  %s784_s2 = inlined_call_operand.vmem [shape: bf16[64,32], index: 2, kind: input, shape index: {}]   ;;  %s785_s3 = inlined_call_operand.vmem [shape: f32[1,32], index: 3, kind: input, shape index: {}]   ;;  %s786_s4 = inlined_call_operand.vmem [shape: f32[1,32], index: 4, kind: input, shape index: {}]   ;;  %s787_s5 = inlined_call_operand.vmem [shape: f32[1,32], index: 5, kind: input, shape index: {}]   ;;  %s788_s6 = inlined_call_operand.hbm [shape: f32[16,32], index: 6, kind: output, shape index: {}]  }
   0x1   :  { %13 = vsyncpa [#allocation3 + $0x1], 0  ;;  %s655_s21 = smov 0   ;;  %s657_s22 = smov 0  }
   0x2   :  { %s659_s23 = smov 0   ;;  %s661_s24 = smov 0  }
   0x3 LB: > { %s676_s25 = sadd.s32 4294967295, %s615_s24   ;;  %s470_s26 = sadd.s32 4294967294, %s615_s24   ;;  %s615_s24 = sphi %s661_s24, %s794_s24   ;;  %s611_s23 = sphi %s659_s23, %s793_s23   ;;  %s607_s22 = sphi %s657_s22, %s792_s22   ;;  %s603_s21 = sphi %s655_s21, %s791_s21  }
   0x4   : > { %s680_s27 = sadd.s32 1, %s615_s24   ;;  %s162_s28 = sadd.s32 1, %s611_s23 }
   0x5   : > { %s159_s29 = ssub.s32 %s615_s24, %s680_s27  ;;  %p172_p0 = scmp.ne.s32.totalorder %s611_s23, %s607_s22 }
   0x6   : > { %p160_p1 = scmp.eq.s32.totalorder %s159_s29, 0  ;;  %p173_p2 = scmp.eq.s32.totalorder %s676_s25, 1 }
   0x7   : > { %p178_p3 = scmp.ne.s32.totalorder %s607_s22, %s603_s21  ;;  %p179_p4 = scmp.eq.s32.totalorder %s470_s26, 1 }
   0x8   : > { %s691_s30 = scalar_select %p160_p1, %s611_s23, %s162_s28  }
   0x9   : > { %p693_p5 = por %p173_p2, %p172_p0  ;;  %p697_p6 = por %p179_p4, %p178_p3 }
   0xa   : > { %p473_p7 = scmp.ge.s32.totalorder %s615_s24, 1  ;;  %p223_p8 = scmp.lt.s32.totalorder %s615_s24, 3 }
   0xc   : > { %p224_p9 = pnand %p473_p7, %p223_p8 }
   0xd   : > { %v547_v0 = vld [vmem:[%s784_s2] sm:$0xff] (!%p224_p9)   ;;  %v617_v1 = vmov (!%p224_p9), 0.0   ;;  %v548_v2 = vld [vmem:[%s784_s2 + $0x8] sm:$0xff] (!%p224_p9)   ;;  %vm618_vm0 = vmmov (!%p224_p9), 0   ;;  %p256_p10 = scmp.lt.s32.totalorder (!%p224_p9), %s676_s25, 1  ;;  %v549_v3 = vld [vmem:[%s784_s2 + $0x10] sm:$0xff] (!%p224_p9)  }
   0xe   : > { %227 = sbr.rel (%p224_p9) target bundleno = 432 (0x1b0), region = 44  ;;  %494 = vmatprep.subr.bf16.mxu0 (!%p224_p9), %v617_v1  ;;  %502 = vmatprep.mubr.msk.bf16.mxu0 (!%p224_p9), %vm618_vm0, %v617_v1  ;;  %v550_v4 = vld [vmem:[%s784_s2 + $0x18] sm:$0xff] (!%p224_p9)   ;;  %vm305_vm1 = vcmask (!%p224_p9), 523264   ;;  %v477_v6 = vld [vmem:[%s785_s3] ss:$0 sm:$0xff] (!%p224_p9)  ;;  %vm353_vm2 = vcmask (!%p224_p9), 261120  }
   0xf   : > { %495 = vmatpush3.bf16.msra.mxu0 (!%p224_p9), %v547_v0  ;;  %v483_v27 = vld [vmem:[%s786_s4] ss:$0 sm:$0xff] (!%p224_p9)  ;;  %s486_s19 = sshll.u32 (!%p224_p9), %s676_s25, 7 }
  0x10   : > { %496 = vmatprep.subr.bf16.mxu0 (!%p224_p9), %v617_v1  ;;  %v484_v29 = vld [vmem:[%s787_s5] ss:$0 sm:$0xff] (!%p224_p9)  ;;  %s739_s9 = scalar_lea.hbm (!%p224_p9), %s788_s6, %s486_s19 }
  0x13   : > { %497 = vmatpush3.bf16.msra.mxu0 (!%p224_p9), %v548_v2 }
  0x14   : > { %498 = vmatprep.subr.bf16.mxu0 (!%p224_p9), %v617_v1 }
  0x15   : > { %s257_s13 = scalar_select %p256_p10, %s676_s25, 1 }
  0x16   : > { %s619_s25 = smov [#allocation2]  }
  0x17   : > { %s475_s16 = sshll.u32 %s257_s13, 2  ;;  %499 = vmatpush3.bf16.msra.mxu0 %v549_v3  ;;  %s476_s28 = sshll.u32 %s257_s13, 3 }
  0x18   : > { %500 = vmatprep.subr.bf16.mxu0 %v617_v1  ;;  %s259_s26 = scalar_lea.vmem %s782_s0, %s475_s16  ;;  %s263_s10 = scalar_lea.vmem %s783_s1, %s476_s28 }
  0x19   : > { %v265_v5 = vld [vmem:[%s259_s26] sm:$0xf]  ;;  %s253_s13 = sand.u32 1, %s607_s22   ;;  %s557_s12 = sshll.u32 %s619_s25, 4  ;;  %s558_s12 = int_to_ptr.vmem [resolvable:$false] %s557_s12 }
  0x1a   : > { %v349_v8 = vld [vmem:[%s263_s10] sm:$0xff]  ;;  %s474_s14 = sshll.u32 %s253_s13, 3  ;;  %s386_s10 = scalar_lea.sflag [#allocation3], %s253_s13 }
  0x1b   : > { %501 = vmatpush3.bf16.msra.mxu0 %v550_v4  ;;  %s255_s20 = scalar_lea.vmem [#allocation2], %s474_s14  ;;  %s559_s14 = scalar_lea.vmem %s558_s12, 256 }
  0x1c   : > { %s399_s26 = sshll.u32 %s255_s20, 4  ;;  %s741_s26 = int_to_ptr.vmem [resolvable:$true] %s399_s26 }
  0x1d   : > { %s553_s11 = scalar_lea.vmem %s741_s26, 128  ;;  %p560_p0 = scmp.lt.s32.totalorder %s741_s26, %s558_s12 }
  0x1e   : > { %503 = vmatmul.mubr.msk.bf16.vlgmr.msra.gmra.mrb[0].mxu0 %vm305_vm1, %v265_v5  ;;  %p554_p11 = scmp.ne.s32.totalorder %s741_s26, %s553_s11  ;;  %p561_p1 = scmp.lt.s32.totalorder %s559_s14, %s553_s11 }
  0x20   : > { %p555_p12 = pnand %p554_p11, %p693_p5  ;;  %p562_p2 = por %p561_p1, %p560_p0 }
  0x22   : > { %p556_p13 = pneg %p555_p12 }
  0x24   : > { %p563_p3 = pnand %p562_p2, %p556_p13 }
  0xf1   : > { %v343_v7 = vpop.f32.mrb[0].mxu0 }
  0xf2   : > { %v344_v9 = vadd.f32 %v477_v6, %v343_v7  ;;  %v504_v10 = vpop.f32.mrb[1].mxu0 }
  0xf3   : > { %v346_v11 = vpop.f32.mrb[2].mxu0 }
  0xf4   : > { %v350_v12 = vadd.f32 %v349_v8, %v344_v9  ;;  %v505_v13 = vpop.f32.mrb[3].mxu0 }
  0xf6   : > { %v354_v14 = vsel %vm353_vm2, %v350_v12, 0.0  ;;  %v357_v15 = vmul.f32 %v350_v12, %v350_v12 }
  0xf7   : > { %355 = vadd.xlane.f32.xlu0 %v354_v14 }
  0xf8   : > { %v358_v16 = vsel %vm353_vm2, %v357_v15, 0.0 }
  0xfb   : > { %359 = vadd.xlane.f32.xlu0 %v358_v16 }
 0x184   : > { %v356_v17 = vpop.xlane.xlu0 %355 }
 0x185   : > { %v361_v18 = vmul.f32 0.03125, %v356_v17 }
 0x187   : > { %v363_v20 = vmul.f32 %v361_v18, %v361_v18  ;;  %v366_v25 = vsub.f32 %v350_v12, %v361_v18 }
 0x188   : > { %v360_v19 = vpop.xlane.xlu0 %359 }
 0x189   : > { %v362_v21 = vmul.f32 0.03125, %v360_v19 }
 0x18b   : > { %v364_v22 = vsub.f32 %v362_v21, %v363_v20 }
 0x18d   : > { %v365_v23 = vmax.f32 %v364_v22, 0.0 }
 0x18f   : > { %v367_v24 = vadd.f32 1e-12, %v365_v23 }
 0x191   : > { %551 = vrsqrt.f32 %v367_v24 }
 0x19b   : > { %v552_v26 = vpop.eup %551 }
 0x19c   : > { %v369_v28 = vmul.f32 %v552_v26, %v366_v25 }
 0x19e   : > { %v376_v30 = vmul.f32 %v483_v27, %v369_v28 }
 0x1a0   : > { %v383_v31 = vadd.f32 %v484_v29, %v376_v30 }
 0x1a2   : > { %384 = vst.msk [vmem:[%s255_s20] sm:$0xff] %vm353_vm2, %v383_v31 }
 0x1a3   : > { %566 = shalt.err (!%p563_p3)
}
 0x1a4   : > { %s567_s13 = scalar_lea.hbm %s739_s9, 128  ;;  %s571_s17 = scalar_lea.hbm %s788_s6, 256 }
 0x1a5   : > { %p568_p4 = scmp.ne.s32.totalorder %s739_s9, %s567_s13  ;;  %p572_p9 = scmp.lt.u32.totalorder %s739_s9, %s788_s6 }
 0x1a6   : > { %p573_p10 = scmp.lt.u32.totalorder %s571_s17, %s567_s13  ;;  %p575_p12 = scmp.lt.u32.totalorder %s567_s13, %s739_s9 }
 0x1a7   : > { %p569_p7 = pnand %p568_p4, %p693_p5 }
 0x1a8   : > { %p574_p11 = por %p573_p10, %p572_p9 }
 0x1a9   : > { %p570_p8 = pneg %p569_p7 }
 0x1aa   : > { %p576_p13 = por %p575_p12, %p574_p11 }
 0x1ac   : > { %p577_p0 = pnand %p576_p13, %p570_p8 }
 0x1ae   : > { %580 = shalt.err (!%p577_p0)
}
 0x1af   : > { %506 = dma.vmem_to_hbm [thread:$0]  (%p693_p5), %s741_s26, 128, %s739_s9, %s386_s10  }
 0x1b0 PF: > { %p512_p1 = scmp.ge.s32.totalorder %s615_s24, 2  ;;  %s411_s20 = sand.u32 1, %s603_s21  }
 0x1b1   : > { %s412_s28 = scalar_lea.sflag [#allocation3], %s411_s20 }
 0x1b2   : > { %p509_p2 = pnand %p512_p1, %p697_p6 }
 0x1b4   : > { %598 = dma.done.wait (!%p509_p2), %s412_s28, 128  }
 0x1b5   : > { %600 = vsyncadd (!%p509_p2), %s412_s28, 4294967168  ;;  %p16_p3 = scmp.ge.s32.totalorder %s680_s27, 4   ;;  %s791_s21 = smov %s607_s22 }
 0x1b6   : > { %s792_s22 = smov %s611_s23  ;;  %s793_s23 = smov %s691_s30 }
 0x1b7   : > { %s794_s24 = smov %s680_s27  ;;  %18 = sbr.rel (!%p16_p3) target bundleno = 3 (0x3), region = 82 }
 0x1be   :  { %417 = vsyncpa [#allocation3], 1 }
 0x1bf   :  { %419 = vsyncpa [#allocation3 + $0x1], 1 }

</bundles_post_ra>
